<compile_context>
chip_gen: v6e
topology: v6e:2x2x1
jax: 0.10.0
libtpu: 0.0.40
codegen_flags: <defaults>
</compile_context>

<pallas_src>
from functools import partial

import jax
import jax.numpy as jnp
from jax.experimental import pallas as pl
from jax.experimental.pallas import tpu as pltpu


def _round_up(x, m):
    return ((x + m - 1) // m) * m


# ---------------------------------------------------------------------------
# Stage 1 (streamed):  hsum[b, :] = sum_t relu(x[b, t, :] @ W1 + b1)
# ---------------------------------------------------------------------------
def _hidden_sum_kernel(x_ref, w1_ref, seg_ref, hsum_ref, *, single_seq_step):
    # x_ref:    (b_tile*t_tile, D+1)   matmul dtype; batch-major token rows, last
    #                                  column is the folded-in ones column for b1.
    # w1_ref:   (D+1, 512)             matmul dtype; last row is b1.
    # seg_ref:  (b_tile, b_tile*t_tile) matmul dtype; block-diagonal ones -> per-batch
    #                                  token sums as an MXU matmul (no XLU sublane
    #                                  reduce, no masked 1-sublane stores).
    # hsum_ref: (b_tile, 512) f32      resident across the token-tile reduction axis.

    # fc[0]: Linear(D -> 512) with bias folded into the augmented column; ReLU.
    h = jnp.dot(x_ref[...], w1_ref[...], preferred_element_type=jnp.float32)
    h = jnp.maximum(h, 0.0).astype(seg_ref.dtype)

    # Per-batch token sum on the MXU (f32 accumulation).
    s = jnp.dot(seg_ref[...], h, preferred_element_type=jnp.float32)

    if single_seq_step:
        hsum_ref[...] = s                       # one token tile: no init/accumulate branch
    else:
        @pl.when(pl.program_id(1) == 0)
        def _():
            hsum_ref[...] = jnp.zeros_like(hsum_ref)
        hsum_ref[...] += s


# ---------------------------------------------------------------------------
# Stage 2 (single step):  out = sigmoid(hsum @ (W2 / T) + b2)
# ---------------------------------------------------------------------------
def _head_kernel(hsum_ref, w2_ref, b2_ref, o_ref, *, apply_sigmoid):
    # hsum_ref: (B_pad, 512) f32; w2_ref: (512, O_pad) f32 pre-scaled by 1/T;
    # b2_ref:   (1, O_pad) f32;   o_ref: (B_pad, O_pad) f32 (lane-dense, 128-padded).
    y = jnp.dot(hsum_ref[...], w2_ref[...], preferred_element_type=jnp.float32)
    y = y + b2_ref[...]
    if apply_sigmoid:
        y = jax.nn.sigmoid(y)
    o_ref[...] = y.astype(o_ref.dtype)


def _choose_tiles(B, T, *, target_m=512, max_t_tile=512):
    """MXU/dtype-aware tile sizes.

    t_tile: multiple of 16 (bf16 sublane packing), <= 512, chosen to minimize T
            zero-padding (never a divisor search, never a fall-back to t_tile == T).
    b_tile: batch elements blocked per grid step so the first matmul's M
            (= b_tile * t_tile) is ~target_m rows; either all of B, a multiple of 8,
            or 1.  By construction b_tile > 1 implies a single token tile.
    """
    n_t = -(-T // max_t_tile)                      # number of token tiles
    t_tile = _round_up(-(-T // n_t), 16)
    b_fit = max(1, target_m // t_tile)
    if B <= b_fit:
        b_tile = B
    elif b_fit >= 8:
        b_tile = (b_fit // 8) * 8                  # 8-aligned second-minor dim for hsum blocks
    else:
        b_tile = 1
    return b_tile, t_tile


def visual_fc_net(x, w1, b1, w2, b2, *, use_sigmoid=True,
                  matmul_dtype=jnp.bfloat16, b_tile=None, t_tile=None):
    """Eval-mode VisualFCNet forward.  x: (B, T, D) -> (B, out_dim) float32."""
    B, T, D = x.shape
    D2, H = w1.shape
    H2, O = w2.shape
    assert D2 == D and H2 == H and b1.shape == (H,) and b2.shape == (O,)

    bt_auto, tt_auto = _choose_tiles(B, T)
    b_tile = bt_auto if b_tile is None else b_tile
    t_tile = tt_auto if t_tile is None else t_tile

    T_pad = _round_up(T, t_tile)
    B_pad = _round_up(B, b_tile)
    nt = T_pad // t_tile
    nb = B_pad // b_tile
    # Flattened-row blocks below require that a step never mixes a partial batch block
    # with multiple token tiles (guaranteed by _choose_tiles).
    assert b_tile == 1 or nt == 1, "b_tile > 1 requires a single token tile"
    D_aug = D + 1
    rows = b_tile * t_tile

    # ---- Stage-1 operands --------------------------------------------------
    # Fold the fc1 bias into the matmul (ones column on x, bias row on W1) and zero-pad
    # B and T.  Padded rows are all-zero (including the ones column), so they add
    # exactly 0 to the hidden sums; the true T is used for the mean via W2 scaling.
    x_aug = jnp.concatenate([x, jnp.ones((B, T, 1), x.dtype)], axis=-1)
    x_aug = jnp.pad(x_aug, ((0, B_pad - B), (0, T_pad - T), (0, 0)))
    x2d = x_aug.astype(matmul_dtype).reshape(B_pad * T_pad, D_aug)

    w1_aug = jnp.concatenate(
        [w1.astype(jnp.float32), b1.astype(jnp.float32).reshape(1, H)], axis=0
    ).astype(matmul_dtype)                                            # (D+1, 512)

    # Block-diagonal ones: seg[i, i*t_tile:(i+1)*t_tile] = 1.
    seg = jnp.kron(jnp.eye(b_tile, dtype=jnp.float32),
                   jnp.ones((1, t_tile), jnp.float32)).astype(matmul_dtype)

    hidden_kernel = partial(_hidden_sum_kernel, single_seq_step=(nt == 1))

    hsum = pl.pallas_call(
        hidden_kernel,
        out_shape=jax.ShapeDtypeStruct((B_pad, H), jnp.float32),
        grid_spec=pltpu.PrefetchScalarGridSpec(
            num_scalar_prefetch=0,
            grid=(nb, nt),
            in_specs=[
                # x rows: streamed, pipelined (b_tile*t_tile, D+1) slabs.
                pl.BlockSpec((rows, D_aug), lambda b, t: (b * nt + t, 0)),
                # W1(+bias row) and the segment matrix: constant index_map -> fetched
                # once and VMEM-resident across the grid.  (w2/b2 live only in the head
                # call; the resident footprint here is small, so no pipeline_mode
                # buffer-count override is needed at these tile sizes.)
                pl.BlockSpec((D_aug, H), lambda b, t: (0, 0)),
                pl.BlockSpec((b_tile, rows), lambda b, t: (0, 0)),
            ],
            # Per-batch-block f32 sums stay resident across the token-tile axis.
            out_specs=pl.BlockSpec((b_tile, H), lambda b, t: (b, 0)),
        ),
        compiler_params=pltpu.CompilerParams(
            # batch blocks are independent (v7x megacore); token tiles are a reduction.
            dimension_semantics=("parallel", "arbitrary")),
    )(x2d, w1_aug, seg)

    # ---- Stage-2 operands: fold 1/T into W2, pad out_dim to a 128-lane group -------
    o_pad = _round_up(O, 128)
    w2_s = jnp.zeros((H, o_pad), jnp.float32).at[:, :O].set(
        w2.astype(jnp.float32) * (1.0 / T))
    b2_p = jnp.zeros((1, o_pad), jnp.float32).at[:, :O].set(b2.astype(jnp.float32))

    # Single-step head: batched M=B_pad matmul + bias + sigmoid, lane-dense store.
    # (For extremely large B this head would want a batch-tiled grid of its own.)
    out_p = pl.pallas_call(
        partial(_head_kernel, apply_sigmoid=use_sigmoid),
        out_shape=jax.ShapeDtypeStruct((B_pad, o_pad), jnp.float32),
    )(hsum, w2_s, b2_p)

    return out_p[:B, :O]


def _torch_like_linear_init(key, fan_in, fan_out):
    """Deterministic init matching nn.Linear's U(-1/sqrt(fan_in), 1/sqrt(fan_in))."""
    kw, kb = jax.random.split(key)
    bound = 1.0 / jnp.sqrt(fan_in)
    w = jax.random.uniform(kw, (fan_in, fan_out), jnp.float32, -bound, bound)
    b = jax.random.uniform(kb, (fan_out,), jnp.float32, -bound, bound)
    return w, b


if __name__ == "__main__":
    # Small shapes consistent with the forward pass: (batch, seq, input_dim)
    B, T, INPUT_DIM, HIDDEN, OUT_DIM = 2, 8, 32, 512, 5

    key = jax.random.PRNGKey(0)
    kx, k1, k2 = jax.random.split(key, 3)

    x = jax.random.normal(kx, (B, T, INPUT_DIM), dtype=jnp.float32)
    w1, b1 = _torch_like_linear_init(k1, INPUT_DIM, HIDDEN)
    w2, b2 = _torch_like_linear_init(k2, HIDDEN, OUT_DIM)

    # Pure-JAX reference (eval-mode forward, original op order: fc -> mean -> sigmoid).
    h_ref = jnp.maximum(x @ w1 + b1, 0.0)
    y_ref = jax.nn.sigmoid(jnp.mean(h_ref @ w2 + b2, axis=1))

    # Optimized path: bf16 MXU inputs, f32 accumulate / epilogue (intentional trade-off).
    out_bf16 = jax.block_until_ready(visual_fc_net(x, w1, b1, w2, b2,
                                                   matmul_dtype=jnp.bfloat16))
    assert out_bf16.shape == (B, OUT_DIM)
    assert jnp.allclose(out_bf16, y_ref, atol=2e-2, rtol=2e-2), "bf16 path mismatch"

    # Full-precision path for a tight numerical check.
    out_f32 = jax.block_until_ready(visual_fc_net(x, w1, b1, w2, b2,
                                                  matmul_dtype=jnp.float32))
    assert jnp.allclose(out_f32, y_ref, atol=1e-4, rtol=1e-4), "f32 path mismatch"

    print("KERNEL_OK")
</pallas_src>

<mosaic_0001>
module attributes {stable_mosaic.version = 11 : i64} {
  func.func @_hidden_sum_kernel(%arg0: i32, %arg1: i32, %arg2: memref<32x33xbf16, #tpu.memory_space<vmem>>, %arg3: memref<33x512xbf16, #tpu.memory_space<vmem>>, %arg4: memref<2x32xbf16, #tpu.memory_space<vmem>>, %arg5: memref<2x512xf32, #tpu.memory_space<vmem>>) attributes {dimension_semantics = [#tpu.dimension_semantics<parallel>, #tpu.dimension_semantics<arbitrary>], iteration_bounds = array<i64: 1, 1>, scalar_prefetch = 0 : i64, scratch_operands = 0 : i64, tpu.core_type = #tpu.core_type<tc>, window_params = [{transform_indices = @transform_0, window_bounds = array<i64: 32, 33>}, {pipeline_mode = #tpu.pipeline_mode<synchronous>, transform_indices = @transform_1, window_bounds = array<i64: 33, 512>}, {pipeline_mode = #tpu.pipeline_mode<synchronous>, transform_indices = @transform_2, window_bounds = array<i64: 2, 32>}, {transform_indices = @transform_3, window_bounds = array<i64: 2, 512>}]} {
    %c0 = arith.constant 0 : index
    %c0_0 = arith.constant 0 : index
    %0 = vector.load %arg2[%c0, %c0_0] : memref<32x33xbf16, #tpu.memory_space<vmem>>, vector<32x33xbf16>
    %c0_1 = arith.constant 0 : index
    %c0_2 = arith.constant 0 : index
    %1 = vector.load %arg3[%c0_1, %c0_2] : memref<33x512xbf16, #tpu.memory_space<vmem>>, vector<33x512xbf16>
    %cst = arith.constant dense<0.000000e+00> : vector<32x512xf32>
    %2 = tpu.matmul %0, %1, %cst {dimension_numbers = #tpu.dot_dimension_numbers<[1], [0], [0], [1], [0, 0, 1, 1], [], []>} : vector<32x33xbf16>, vector<33x512xbf16>, vector<32x512xf32> -> vector<32x512xf32>
    %cst_3 = arith.constant 0.000000e+00 : f32
    %3 = vector.broadcast %cst_3 : f32 to vector<32x512xf32>
    %4 = arith.maximumf %2, %3 : vector<32x512xf32>
    %5 = arith.truncf %4 : vector<32x512xf32> to vector<32x512xbf16>
    %c0_4 = arith.constant 0 : index
    %c0_5 = arith.constant 0 : index
    %6 = vector.load %arg4[%c0_4, %c0_5] : memref<2x32xbf16, #tpu.memory_space<vmem>>, vector<2x32xbf16>
    %cst_6 = arith.constant dense<0.000000e+00> : vector<2x512xf32>
    %7 = tpu.matmul %6, %5, %cst_6 {dimension_numbers = #tpu.dot_dimension_numbers<[1], [0], [0], [1], [0, 0, 1, 1], [], []>} : vector<2x32xbf16>, vector<32x512xbf16>, vector<2x512xf32> -> vector<2x512xf32>
    %c0_7 = arith.constant 0 : index
    %c0_8 = arith.constant 0 : index
    %8 = vector.load %arg5[%c0_7, %c0_8] : memref<2x512xf32, #tpu.memory_space<vmem>>, vector<2x512xf32>
    tpu.vector_store %arg5[%c0_7, %c0_8], %7 {strides = array<i32>} : memref<2x512xf32, #tpu.memory_space<vmem>>, vector<2x512xf32>,
    return
  }
  func.func @transform_0(%arg0: i32, %arg1: i32) -> (i32, i32) {
    %c1_i32 = arith.constant 1 : i32
    %0 = arith.muli %arg0, %c1_i32 : i32
    %1 = arith.addi %0, %arg1 : i32
    %c0_i32 = arith.constant 0 : i32
    %c0_i32_0 = arith.constant 0 : i32
    return %1, %c0_i32 : i32, i32
  }
  func.func @transform_1(%arg0: i32, %arg1: i32) -> (i32, i32) {
    %c0_i32 = arith.constant 0 : i32
    %c0_i32_0 = arith.constant 0 : i32
    %c0_i32_1 = arith.constant 0 : i32
    return %c0_i32, %c0_i32_0 : i32, i32
  }
  func.func @transform_2(%arg0: i32, %arg1: i32) -> (i32, i32) {
    %c0_i32 = arith.constant 0 : i32
    %c0_i32_0 = arith.constant 0 : i32
    %c0_i32_1 = arith.constant 0 : i32
    return %c0_i32, %c0_i32_0 : i32, i32
  }
  func.func @transform_3(%arg0: i32, %arg1: i32) -> (i32, i32) {
    %c0_i32 = arith.constant 0 : i32
    %c0_i32_0 = arith.constant 0 : i32
    return %arg0, %c0_i32 : i32, i32
  }
}

</mosaic_0001>

<bundles_post_ra>
// kernel: tpu_custom_call.1
= control target key start
LH: loop header
LB: loop body
LE: loop exit
PB: predicated region body
PF: predicated region fallthrough
CT: control target
= control target key end

     0   :  { %8 = vsyncpa [#allocation3], 0  ;;  %s556_s0 = inlined_call_operand.hbm [shape: bf16[32,33], index: 0, kind: input, shape index: {}]   ;;  %s557_s1 = inlined_call_operand.hbm [shape: bf16[33,512], index: 1, kind: input, shape index: {}]   ;;  %s558_s2 = inlined_call_operand.vmem [shape: bf16[2,32], index: 2, kind: input, shape index: {}]   ;;  %s559_s3 = inlined_call_operand.hbm [shape: f32[2,512], index: 3, kind: output, shape index: {}]  }
   0x1   :  { %9 = vsyncpa [#allocation6], 0 }
   0x2   :  { %10 = vsyncpa [#allocation4], 0  ;;  %s515_s12 = smov [#allocation2]  }
   0x3   :  { %s20_s13 = sshll.u32 %s515_s12, 4  ;;  %s21_s13 = int_to_ptr.vmem [resolvable:$true] %s20_s13 }
   0x4   :  { %s457_s14 = scalar_lea.vmem %s21_s13, 256  ;;  %p462_p1 = scmp.lt.s32.totalorder %s21_s13, %s21_s13 }
   0x5   :  { %p458_p0 = scmp.ne.s32.totalorder %s21_s13, %s457_s14  ;;  %p463_p2 = scmp.lt.s32.totalorder %s457_s14, %s457_s14 }
   0x7   :  { %p464_p3 = por %p463_p2, %p462_p1 }
   0x9   :  { %p465_p4 = pnand %p464_p3, %p458_p0 }
   0xb   :  { %468 = shalt.err (!%p465_p4)
}
   0xc   :  { %s516_s15 = smov 64   ;;  %s517_s16 = smov 4  }
   0xd   :  { %26 = dma.hbm_to_vmem [thread:$0]  %s556_s0, 256, %s21_s13, [#allocation3], %s516_s15, %s516_s15, %s517_s16  }
   0xe   :  { %s518_s19 = smov [#allocation5]  }
   0xf   :  { %s32_s20 = sshll.u32 %s518_s19, 4  ;;  %s33_s20 = int_to_ptr.vmem [resolvable:$true] %s32_s20 }
  0x10   :  { %s477_s21 = scalar_lea.vmem %s33_s20, 1280  ;;  %p482_p6 = scmp.lt.s32.totalorder %s33_s20, %s33_s20 }
  0x11   :  { %p478_p5 = scmp.ne.s32.totalorder %s33_s20, %s477_s21  ;;  %p483_p7 = scmp.lt.s32.totalorder %s477_s21, %s477_s21 }
  0x13   :  { %p484_p8 = por %p483_p7, %p482_p6 }
  0x15   :  { %p485_p9 = pnand %p484_p8, %p478_p5 }
  0x17   :  { %488 = shalt.err (!%p485_p9)
}
  0x18   :  { %s519_s22 = smov 256   ;;  %s520_s23 = smov 16  }
  0x19   :  { %38 = dma.hbm_to_vmem [thread:$0]  %s557_s1, 1280, %s33_s20, [#allocation6], %s519_s22, %s519_s22, %s520_s23  }
  0x1a   :  { %509 = dma.done.wait [#allocation3], 256  }
  0x1b   :  { %510 = vsyncadd [#allocation3], 4294967040 }
  0x1c   :  { %511 = dma.done.wait [#allocation6], 1280  }
  0x1d   :  { %512 = vsyncadd [#allocation6], 4294966016  ;;  %v521_v0 = vmov 0   ;;  %vm131_vm0 = vcmask 1040384   ;;  %v62_v1 = vld [vmem:[#allocation5 + $0x40] sm:$0x11] }
  0x1e   :  { %178 = vmatprep.mubr.bf16.mxu0 %v521_v0  ;;  %231 = vmatprep.mubr.bf16.mxu1 %v521_v0  ;;  %v133_v2 = vsel %vm131_vm0, 65535, %v521_v0  ;;  %v63_v3 = vld [vmem:[#allocation5 + $0x48] sm:$0x11]  ;;  %v413_v4 = vcombine.high %v62_v1, %v62_v1  ;;  %v412_v6 = vcombine.low %v62_v1, %v62_v1  ;;  %v435_v8 = vld [vmem:[#allocation5 + $0x24] ss:$16 sps:$4 sm:$0xff]   ;;  %vm124_vm1 = vcmask 269312  }
  0x1f   :  { %v415_v5 = vcombine.high %v63_v3, %v63_v3  ;;  %v414_v7 = vcombine.low %v63_v3, %v63_v3  ;;  %v437_v13 = vld [vmem:[#allocation5 + $0x2c] ss:$16 sps:$4 sm:$0xff]   ;;  %v439_v14 = vld [vmem:[#allocation5 + $0x20] ss:$16 sps:$4 sm:$0xff]   ;;  %v440_v15 = vld [vmem:[#allocation5 + $0x28] ss:$16 sps:$4 sm:$0xff]   ;;  %v372_v1 = vlaneseq }
  0x20   :  { %v138_v9 = vand.u32 %v413_v4, %v133_v2  ;;  %v135_v11 = vand.u32 %v412_v6, %v133_v2  ;;  %v441_v16 = vld [vmem:[#allocation5 + $0x4] ss:$16 sps:$4 sm:$0xff]   ;;  %v443_v17 = vld [vmem:[#allocation5 + $0xc] ss:$16 sps:$4 sm:$0xff]   ;;  %v445_v18 = vld [vmem:[#allocation5] ss:$16 sps:$4 sm:$0xff]  }
  0x21   :  { %v144_v10 = vand.u32 %v415_v5, %v133_v2  ;;  %v141_v12 = vand.u32 %v414_v7, %v133_v2  ;;  %v446_v19 = vld [vmem:[#allocation5 + $0x8] ss:$16 sps:$4 sm:$0xff]   ;;  %v447_v20 = vld [vmem:[#allocation2] sm:$0xff]   ;;  %vm277_vm2 = vcmask 261120   ;;  %v522_v63 = vmov 1983009808  }
  0x22   :  { %156 = vmatprep.subr.bf16.mxu0 %v138_v9  ;;  %v448_v21 = vld [vmem:[#allocation2 + $0x8] sm:$0xff]   ;;  %v276_v62 = vld [vmem:[%s558_s2] sm:$0x1]  ;;  %v373_v3 = vshrl.u32 %v372_v1, 7  ;;  %s523_s26 = smov [#allocation7]  }
  0x23   :  { %209 = vmatprep.subr.bf16.mxu1 %v144_v10  ;;  %157 = vmatpush1.bf16.msra.mxu0 %v135_v11  ;;  %s392_s27 = sshll.u32 %s523_s26, 4  ;;  %s393_s27 = int_to_ptr.vmem [resolvable:$true] %s392_s27 }
  0x24   :  { %210 = vmatpush1.bf16.msra.mxu1 %v141_v12  ;;  %158 = vmatprep.subr.bf16.mxu0 %v435_v8  ;;  %s489_s2 = scalar_lea.vmem %s393_s27, 128  ;;  %p494_p11 = scmp.lt.s32.totalorder %s393_s27, %s393_s27 }
  0x25   :  { %211 = vmatprep.subr.bf16.mxu1 %v437_v13  ;;  %p490_p10 = scmp.ne.s32.totalorder %s393_s27, %s489_s2  ;;  %p495_p12 = scmp.lt.s32.totalorder %s489_s2, %s489_s2 }
  0x27   :  { %159 = vmatpush1.bf16.msra.mxu0 %v439_v14  ;;  %p496_p13 = por %p495_p12, %p494_p11 }
  0x28   :  { %212 = vmatpush1.bf16.msra.mxu1 %v440_v15  ;;  %160 = vmatprep.subr.bf16.mxu0 %v441_v16 }
  0x29   :  { %213 = vmatprep.subr.bf16.mxu1 %v443_v17  ;;  %p497_p0 = pnand %p496_p13, %p490_p10 }
  0x2b   :  { %161 = vmatpush1.bf16.msra.mxu0 %v445_v18 }
  0x2c   :  { %214 = vmatpush1.bf16.msra.mxu1 %v446_v19 }
  0x2e   :  { %416 = vmatmul.mubr.msk.bf16.vlgmr.msra.gmra.mxu0 %vm124_vm1, %v447_v20 }
  0x2f   :  { %418 = vmatmul.mubr.msk.bf16.vlgmr.msra.gmra.mxu1 %vm124_vm1, %v447_v20  ;;  %188 = vmatprep.mubr.bf16.mxu0 %v521_v0 }
  0x30   :  { %241 = vmatprep.mubr.bf16.mxu1 %v521_v0 }
  0x36   :  { %417 = vmatmul.mubr.msk.bf16.gmra.mxu0 %vm124_vm1, %v448_v21 }
  0x37   :  { %419 = vmatmul.mubr.msk.bf16.gmra.mxu1 %vm124_vm1, %v448_v21  ;;  %313 = vmatprep.mubr.bf16.mxu0 %v521_v0 }
  0x38   :  { %354 = vmatprep.mubr.bf16.mxu1 %v521_v0  ;;  %v370_v0 = vunpack.c.l.s4 %v522_v63 }
  0x3a   :  { %v371_v2 = vunpack.c.0.s8 %v370_v0 }
  0x3c   :  { %v374_v6 = vsub.s32 %v371_v2, %v373_v3 }
  0xee   :  { %v180_v22 = vpop.f32.mrf.mxu0 }
  0xef   :  { %v233_v23 = vpop.f32.mrf.mxu1  ;;  %v252_v58 = vmax.f32 %v180_v22, 0.0 }
  0xf0   :  { %v182_v24 = vpop.f32.mrf.mxu0  ;;  %v254_v59 = vmax.f32 %v233_v23, 0.0 }
  0xf1   :  { %v235_v25 = vpop.f32.mrf.mxu1  ;;  %v253_v48 = vmax.f32 %v182_v24, 0.0 }
  0xf2   :  { %v184_v26 = vpop.f32.mrf.mxu0  ;;  %v255_v49 = vmax.f32 %v235_v25, 0.0 }
  0xf3   :  { %v237_v27 = vpop.f32.mrf.mxu1  ;;  %v256_v52 = vmax.f32 %v184_v26, 0.0 }
  0xf4   :  { %v186_v28 = vpop.f32.mrf.mxu0  ;;  %v258_v53 = vmax.f32 %v237_v27, 0.0 }
  0xf5   :  { %v239_v29 = vpop.f32.mrf.mxu1  ;;  %v257_v36 = vmax.f32 %v186_v28, 0.0  ;;  %v268_v60 = vpack.c.bf16 %v256_v52, %v252_v58 }
  0xf6   :  { %v190_v30 = vpop.f32.mrf.mxu0  ;;  %v259_v37 = vmax.f32 %v239_v29, 0.0  ;;  %v270_v61 = vpack.c.bf16 %v258_v53, %v254_v59 }
  0xf7   :  { %v243_v31 = vpop.f32.mrf.mxu1  ;;  %v260_v46 = vmax.f32 %v190_v30, 0.0  ;;  %v269_v56 = vpack.c.bf16 %v257_v36, %v253_v48 }
  0xf8   :  { %v192_v32 = vpop.f32.mrf.mxu0  ;;  %v262_v47 = vmax.f32 %v243_v31, 0.0  ;;  %v271_v57 = vpack.c.bf16 %v259_v37, %v255_v49 }
  0xf9   :  { %v245_v33 = vpop.f32.mrf.mxu1  ;;  %v261_v42 = vmax.f32 %v192_v32, 0.0 }
  0xfa   :  { %v194_v34 = vpop.f32.mrf.mxu0  ;;  %v263_v43 = vmax.f32 %v245_v33, 0.0 }
  0xfb   :  { %v247_v35 = vpop.f32.mrf.mxu1  ;;  %v264_v38 = vmax.f32 %v194_v34, 0.0 }
  0xfc   :  { %v266_v39 = vmax.f32 %v247_v35, 0.0  ;;  %v196_v40 = vpop.f32.mrf.mxu0 }
  0xfd   :  { %v249_v41 = vpop.f32.mrf.mxu1  ;;  %v265_v44 = vmax.f32 %v196_v40, 0.0  ;;  %v272_v54 = vpack.c.bf16 %v264_v38, %v260_v46 }
  0xfe   :  { %v267_v45 = vmax.f32 %v249_v41, 0.0  ;;  %v274_v55 = vpack.c.bf16 %v266_v39, %v262_v47 }
  0xff   :  { %v273_v50 = vpack.c.bf16 %v265_v44, %v261_v42 }
 0x100   :  { %v275_v51 = vpack.c.bf16 %v267_v45, %v263_v43 }
 0x101   :  { %293 = vmatprep.subr.bf16.mxu0 %v273_v50 }
 0x102   :  { %334 = vmatprep.subr.bf16.mxu1 %v275_v51  ;;  %294 = vmatpush1.bf16.msra.mxu0 %v272_v54 }
 0x103   :  { %335 = vmatpush1.bf16.msra.mxu1 %v274_v55  ;;  %295 = vmatprep.subr.bf16.mxu0 %v269_v56 }
 0x104   :  { %336 = vmatprep.subr.bf16.mxu1 %v271_v57 }
 0x106   :  { %296 = vmatpush1.bf16.msra.mxu0 %v268_v60 }
 0x107   :  { %337 = vmatpush1.bf16.msra.mxu1 %v270_v61 }
 0x109   :  { %420 = vmatmul.mubr.msk.bf16.vlgmr.msra.gmra.mxu0 %vm277_vm2, %v276_v62 }
 0x10a   :  { %421 = vmatmul.mubr.msk.bf16.vlgmr.msra.gmra.mxu1 %vm277_vm2, %v276_v62 }
 0x1c9   :  { %v315_v4 = vpop.f32.mrf.mxu0 }
 0x1ca   :  { %v356_v5 = vpop.f32.mrf.mxu1 }
 0x1cb   :  { %v317_v7 = vpop.f32.mrf.mxu0 }
 0x1cc   :  { %v358_v8 = vpop.f32.mrf.mxu1  ;;  %v367_v9 = vcombine.low %v315_v4, %v317_v7 }
 0x1cd   :  { %v368_v10 = vcombine.low %v356_v5, %v358_v8  ;;  %v319_v11 = vpop.f32.mrf.mxu0 }
 0x1ce   :  { %v360_v12 = vpop.f32.mrf.mxu1  ;;  %v375_v13 = vrot.slane %v367_v9, %v374_v6 }
 0x1cf   :  { %v382_v14 = vrot.slane %v368_v10, %v374_v6  ;;  %v320_v15 = vpop.f32.mrf.mxu0 }
 0x1d0   :  { %v361_v16 = vpop.f32.mrf.mxu1 }
 0x1d1   :  { %v383_v17 = vcombine.low %v375_v13, %v382_v14 }
 0x1d3   :  { %385 = vst [vmem:[#allocation7] sm:$0xff] %v383_v17 }
 0x1d4   :  { %500 = shalt.err (!%p497_p0)
}
 0x1d5   :  { %395 = dma.vmem_to_hbm [thread:$0]  %s393_s27, 128, %s559_s3, [#allocation4]  }
 0x1d6   :  { %513 = dma.done.wait [#allocation4], 128  }
 0x1d7   :  { %514 = vsyncadd [#allocation4], 4294967168 }
 0x1d8   :  { %399 = vsyncpa [#allocation3], 1 }
 0x1d9   :  { %400 = vsyncpa [#allocation6], 1 }
 0x1da   :  { %401 = vsyncpa [#allocation4], 1 }

</bundles_post_ra>
